<compile_context>
chip_gen: v6e
topology: v6e:2x2x1
jax: 0.10.0
libtpu: 0.0.40
codegen_flags: <defaults>
</compile_context>

<pallas_src>
import jax
import jax.numpy as jnp
import numpy as np
from jax.experimental import pallas as pl
from jax.experimental.pallas import tpu as pltpu


def _round_up(x, m):
    return ((x + m - 1) // m) * m


def _sample_scatter_max_kernel(c_ref, f_ref, o_ref):
    """Per-sample k-way max pooling for one (stack, sample-block, point-tile) step.

    c_ref : (1, g, TI, 1)  int32  local cluster id per point in [0, k); -1 = padding
    f_ref : (1, g, TI, D)  float  point features
    o_ref : (1, k, g, D)   float  per-(cluster, sample) max; resident across the
                                  point-tile (reduction) axis
    """
    p = pl.program_id(2)
    k = o_ref.shape[1]

    feat = f_ref[0]                                    # (g, TI, D)
    cid = c_ref[0]                                     # (g, TI, 1)
    neg = jnp.array(-jnp.inf, feat.dtype)

    # One masked max over this tile's points per local cluster id (static, small k).
    upd = [jnp.max(jnp.where(cid == c, feat, neg), axis=1) for c in range(k)]  # k x (g, D)

    @pl.when(p == 0)
    def _():
        # First tile: write the update directly (no full-fill-then-maximum pass).
        for c in range(k):
            o_ref[0, c] = upd[c]

    @pl.when(p != 0)
    def _():
        # Later tiles: running max against the resident accumulator.
        for c in range(k):
            o_ref[0, c] = jnp.maximum(o_ref[0, c], upd[c])

    @pl.when(p == pl.num_programs(2) - 1)
    def _():
        # torch_scatter >= 2.0 semantics: clusters that receive no points -> 0.
        o_ref[0] = jnp.where(o_ref[0] == neg, jnp.zeros_like(o_ref[0]), o_ref[0])


def _choose_blocks(N, I, D, k, itemsize, budget_bytes):
    """Pick (g = samples per block, TI = point-tile rows) under a VMEM budget."""
    d_vmem = max(_round_up(D, 128), 128)               # minor dim lane-pads to 128 in VMEM
    i8 = _round_up(I, 8)

    def fits(g, ti):
        feat = 2 * g * ti * d_vmem * itemsize          # double-buffered feature tiles
        ids = 2 * g * ti * 128 * 4                     # (TI, 1) id tiles pad to 128 lanes
        outp = 2 * k * _round_up(g, 8) * d_vmem * itemsize  # resident output block
        return feat + ids + outp <= budget_bytes

    if N <= 8:
        g_cands = [N]                                  # full-dim escape of the (8,128) rule
    else:
        g_cands = [g for g in (64, 32, 16, 8) if g <= N] or [8]

    # Prefer no point-axis tiling; among fitting g, minimise sample padding, then
    # take the largest block (fewest grid steps).
    best_key, best_g = None, None
    for g in g_cands:
        if fits(g, i8):
            key = (_round_up(N, g), -g)
            if best_key is None or key < best_key:
                best_key, best_g = key, g
    if best_g is not None:
        return best_g, i8

    # Working set too large even at the smallest sample block: tile the point axis.
    g = g_cands[-1]
    per_row = 2 * g * d_vmem * itemsize + 2 * g * 128 * 4
    outp = 2 * k * _round_up(g, 8) * d_vmem * itemsize
    ti_max = max(8, ((max(budget_bytes - outp, per_row * 8)) // per_row) // 8 * 8)
    n_tiles = -(-i8 // ti_max)
    ti = _round_up(-(-i8 // n_tiles), 8)               # caps point padding at <= 7 rows
    return g, ti


def maxpool_stack_forward(feature_matrix_batch, cluster_index, k,
                          *, vmem_budget_bytes=12 << 20):
    """Pallas implementation of MaxPoolStack.forward.

    feature_matrix_batch : [S, N, I, D] float
    cluster_index        : [S, N*I] int  (sample n's points have ids in [n*k, (n+1)*k))
    returns              : [S, N, k, D] float (same dtype as the input)
    """
    S, N, I, D = feature_matrix_batch.shape
    dtype = feature_matrix_batch.dtype
    if not jnp.issubdtype(dtype, jnp.floating):
        raise ValueError(f"MaxPoolStack kernel expects floating features, got {dtype}")

    # Local cluster id per point (K-Means-Conv assigns sample n's points global ids
    # in [n*k, (n+1)*k)).  Ids outside the sample's range never match (dropped).
    # TODO(synk): if that invariant can be violated, fall back to a dense NK-block
    # scatter-max formulation instead of the per-sample structured kernel.
    cid = cluster_index.reshape(S, N, I).astype(jnp.int32)
    local = cid - (jnp.arange(N, dtype=jnp.int32) * k)[None, :, None]
    local = jnp.where((local >= 0) & (local < k), local, jnp.int32(-1))

    g, TI = _choose_blocks(N, I, D, k, jnp.dtype(dtype).itemsize, vmem_budget_bytes)
    N_pad = _round_up(N, g)
    I_pad = _round_up(I, TI)

    feats = feature_matrix_batch
    if N_pad > N or I_pad > I:
        feats = jnp.pad(feats, ((0, 0), (0, N_pad - N), (0, I_pad - I), (0, 0)))
        local = jnp.pad(local, ((0, 0), (0, N_pad - N), (0, I_pad - I)),
                        constant_values=-1)
    local = local.reshape(S, N_pad, I_pad, 1)          # sublane-major id layout

    grid = (S, N_pad // g, I_pad // TI)                # reduction (point-tile) axis last

    out = pl.pallas_call(
        _sample_scatter_max_kernel,
        out_shape=jax.ShapeDtypeStruct((S, k, N_pad, D), dtype),
        grid=grid,
        in_specs=[
            pl.BlockSpec((1, g, TI, 1), lambda s, nb, it: (s, nb, it, 0)),   # local ids
            pl.BlockSpec((1, g, TI, D), lambda s, nb, it: (s, nb, it, 0)),   # features
        ],
        out_specs=pl.BlockSpec((1, k, g, D), lambda s, nb, it: (s, 0, nb, 0)),
        compiler_params=pltpu.CompilerParams(
            dimension_semantics=("parallel", "parallel", "arbitrary")),
    )(local, feats)

    # (S, k, N, D) -> (S, N, k, D)
    return jnp.transpose(out[:, :, :N, :], (0, 2, 1, 3))


def _reference(feature_matrix_batch, cluster_index, k):
    """Pure-JAX reference: per-slice segment_max (== torch_scatter.scatter_max)."""
    S, N, I, D = feature_matrix_batch.shape
    feats = feature_matrix_batch.reshape(S, N * I, D)
    cidx = cluster_index.reshape(S, N * I)
    outs = []
    for s in range(S):
        seg = jax.ops.segment_max(feats[s], cidx[s], num_segments=N * k)
        seg = jnp.where(jnp.isneginf(seg), 0.0, seg)   # empty-cluster fill = 0
        outs.append(seg.reshape(N, k, D))
    return jnp.stack(outs)


if __name__ == "__main__":
    # MaxPoolStack(stack_size=2, k=4); MaxPool has no learnable parameters
    # (init_weights only touches nn.Linear, of which there are none).
    stack_size, k = 2, 4
    N, I, D = 2, 16, 32

    key = jax.random.PRNGKey(0)
    kf, kc = jax.random.split(key)

    feature_matrix_batch = jax.random.normal(
        kf, (stack_size, N, I, D), dtype=jnp.float32)

    # Cluster ids: points of sample n land in clusters [n*k, (n+1)*k), each
    # cluster receives >= 1 point (the ShrinkingUnit / K-Means-Conv invariant).
    perm_keys = jax.random.split(kc, stack_size * N)
    local = jnp.stack([
        jax.random.permutation(perm_keys[j], jnp.arange(I) % k)
        for j in range(stack_size * N)
    ]).reshape(stack_size, N, I)
    offsets = (jnp.arange(N) * k)[None, :, None]
    cluster_index = (local + offsets).reshape(stack_size, N * I).astype(jnp.int32)

    out = maxpool_stack_forward(feature_matrix_batch, cluster_index, k)
    out = jax.block_until_ready(out)

    ref = _reference(feature_matrix_batch, cluster_index, k)
    assert out.shape == (stack_size, N, k, D), out.shape
    np.testing.assert_allclose(np.asarray(out), np.asarray(ref), rtol=1e-6, atol=1e-6)

    print("KERNEL_OK")
</pallas_src>

<mosaic_0001>
module attributes {stable_mosaic.version = 11 : i64} {
  func.func @_sample_scatter_max_kernel(%arg0: i32, %arg1: i32, %arg2: i32, %arg3: memref<1x2x16x1xi32, #tpu.memory_space<vmem>>, %arg4: memref<1x2x16x32xf32, #tpu.memory_space<vmem>>, %arg5: memref<1x4x2x32xf32, #tpu.memory_space<vmem>>) attributes {dimension_semantics = [#tpu.dimension_semantics<parallel>, #tpu.dimension_semantics<parallel>, #tpu.dimension_semantics<arbitrary>], iteration_bounds = array<i64: 2, 1, 1>, scalar_prefetch = 0 : i64, scratch_operands = 0 : i64, tpu.core_type = #tpu.core_type<tc>, window_params = [{transform_indices = @transform_0, window_bounds = array<i64: 1, 2, 16, 1>}, {transform_indices = @transform_1, window_bounds = array<i64: 1, 2, 16, 32>}, {transform_indices = @transform_2, window_bounds = array<i64: 1, 4, 2, 32>}]} {
    %c0 = arith.constant 0 : index
    %c0_0 = arith.constant 0 : index
    %c0_1 = arith.constant 0 : index
    %c0_2 = arith.constant 0 : index
    %0 = vector.load %arg4[%c0, %c0_0, %c0_1, %c0_2] : memref<1x2x16x32xf32, #tpu.memory_space<vmem>>, vector<1x2x16x32xf32>
    %1 = vector.shape_cast %0 : vector<1x2x16x32xf32> to vector<2x16x32xf32>
    %c0_3 = arith.constant 0 : index
    %c0_4 = arith.constant 0 : index
    %c0_5 = arith.constant 0 : index
    %c0_6 = arith.constant 0 : index
    %2 = vector.load %arg3[%c0_3, %c0_4, %c0_5, %c0_6] : memref<1x2x16x1xi32, #tpu.memory_space<vmem>>, vector<1x2x16x1xi32>
    %3 = vector.shape_cast %2 : vector<1x2x16x1xi32> to vector<2x16x1xi32>
    %c0_i32 = arith.constant 0 : i32
    %4 = vector.broadcast %c0_i32 : i32 to vector<2x16x1xi32>
    %5 = arith.cmpi eq, %3, %4 : vector<2x16x1xi32>
    %cst = arith.constant 0xFF800000 : f32
    %6 = vector.shape_cast %5 : vector<2x16x1xi1> to vector<2x16x1xi1>
    %7 = vector.broadcast %6 : vector<2x16x1xi1> to vector<2x16x32xi1>
    %8 = vector.broadcast %cst : f32 to vector<2x16x32xf32>
    %9 = arith.select %7, %1, %8 : vector<2x16x32xi1>, vector<2x16x32xf32>
    %cst_7 = arith.constant dense<0xFF800000> : vector<2x32xf32>
    %10 = vector.multi_reduction <maximumf>, %9, %cst_7 [1] : vector<2x16x32xf32> to vector<2x32xf32>
    %c1_i32 = arith.constant 1 : i32
    %11 = vector.broadcast %c1_i32 : i32 to vector<2x16x1xi32>
    %12 = arith.cmpi eq, %3, %11 : vector<2x16x1xi32>
    %cst_8 = arith.constant 0xFF800000 : f32
    %13 = vector.shape_cast %12 : vector<2x16x1xi1> to vector<2x16x1xi1>
    %14 = vector.broadcast %13 : vector<2x16x1xi1> to vector<2x16x32xi1>
    %15 = vector.broadcast %cst_8 : f32 to vector<2x16x32xf32>
    %16 = arith.select %14, %1, %15 : vector<2x16x32xi1>, vector<2x16x32xf32>
    %cst_9 = arith.constant dense<0xFF800000> : vector<2x32xf32>
    %17 = vector.multi_reduction <maximumf>, %16, %cst_9 [1] : vector<2x16x32xf32> to vector<2x32xf32>
    %c2_i32 = arith.constant 2 : i32
    %18 = vector.broadcast %c2_i32 : i32 to vector<2x16x1xi32>
    %19 = arith.cmpi eq, %3, %18 : vector<2x16x1xi32>
    %cst_10 = arith.constant 0xFF800000 : f32
    %20 = vector.shape_cast %19 : vector<2x16x1xi1> to vector<2x16x1xi1>
    %21 = vector.broadcast %20 : vector<2x16x1xi1> to vector<2x16x32xi1>
    %22 = vector.broadcast %cst_10 : f32 to vector<2x16x32xf32>
    %23 = arith.select %21, %1, %22 : vector<2x16x32xi1>, vector<2x16x32xf32>
    %cst_11 = arith.constant dense<0xFF800000> : vector<2x32xf32>
    %24 = vector.multi_reduction <maximumf>, %23, %cst_11 [1] : vector<2x16x32xf32> to vector<2x32xf32>
    %c3_i32 = arith.constant 3 : i32
    %25 = vector.broadcast %c3_i32 : i32 to vector<2x16x1xi32>
    %26 = arith.cmpi eq, %3, %25 : vector<2x16x1xi32>
    %cst_12 = arith.constant 0xFF800000 : f32
    %27 = vector.shape_cast %26 : vector<2x16x1xi1> to vector<2x16x1xi1>
    %28 = vector.broadcast %27 : vector<2x16x1xi1> to vector<2x16x32xi1>
    %29 = vector.broadcast %cst_12 : f32 to vector<2x16x32xf32>
    %30 = arith.select %28, %1, %29 : vector<2x16x32xi1>, vector<2x16x32xf32>
    %cst_13 = arith.constant dense<0xFF800000> : vector<2x32xf32>
    %31 = vector.multi_reduction <maximumf>, %30, %cst_13 [1] : vector<2x16x32xf32> to vector<2x32xf32>
    %c0_i32_14 = arith.constant 0 : i32
    %32 = arith.cmpi eq, %arg2, %c0_i32_14 : i32
    %33 = arith.extui %32 : i1 to i32
    %c0_i32_15 = arith.constant 0 : i32
    %34 = arith.cmpi ne, %33, %c0_i32_15 : i32
    scf.if %34 {
      %c0_21 = arith.constant 0 : index
      %c0_22 = arith.constant 0 : index
      %c0_23 = arith.constant 0 : index
      %c0_24 = arith.constant 0 : index
      %41 = vector.load %arg5[%c0_21, %c0_22, %c0_23, %c0_24] : memref<1x4x2x32xf32, #tpu.memory_space<vmem>>, vector<1x1x2x32xf32>
      %42 = vector.shape_cast %41 : vector<1x1x2x32xf32> to vector<2x32xf32>
      %43 = vector.shape_cast %10 : vector<2x32xf32> to vector<1x1x2x32xf32>
      tpu.vector_store %arg5[%c0_21, %c0_22, %c0_23, %c0_24], %43 {strides = array<i32>} : memref<1x4x2x32xf32, #tpu.memory_space<vmem>>, vector<1x1x2x32xf32>,
      %c0_25 = arith.constant 0 : index
      %c1 = arith.constant 1 : index
      %c0_26 = arith.constant 0 : index
      %c0_27 = arith.constant 0 : index
      %44 = vector.load %arg5[%c0_25, %c1, %c0_26, %c0_27] : memref<1x4x2x32xf32, #tpu.memory_space<vmem>>, vector<1x1x2x32xf32>
      %45 = vector.shape_cast %44 : vector<1x1x2x32xf32> to vector<2x32xf32>
      %46 = vector.shape_cast %17 : vector<2x32xf32> to vector<1x1x2x32xf32>
      tpu.vector_store %arg5[%c0_25, %c1, %c0_26, %c0_27], %46 {strides = array<i32>} : memref<1x4x2x32xf32, #tpu.memory_space<vmem>>, vector<1x1x2x32xf32>,
      %c0_28 = arith.constant 0 : index
      %c2 = arith.constant 2 : index
      %c0_29 = arith.constant 0 : index
      %c0_30 = arith.constant 0 : index
      %47 = vector.load %arg5[%c0_28, %c2, %c0_29, %c0_30] : memref<1x4x2x32xf32, #tpu.memory_space<vmem>>, vector<1x1x2x32xf32>
      %48 = vector.shape_cast %47 : vector<1x1x2x32xf32> to vector<2x32xf32>
      %49 = vector.shape_cast %24 : vector<2x32xf32> to vector<1x1x2x32xf32>
      tpu.vector_store %arg5[%c0_28, %c2, %c0_29, %c0_30], %49 {strides = array<i32>} : memref<1x4x2x32xf32, #tpu.memory_space<vmem>>, vector<1x1x2x32xf32>,
      %c0_31 = arith.constant 0 : index
      %c3 = arith.constant 3 : index
      %c0_32 = arith.constant 0 : index
      %c0_33 = arith.constant 0 : index
      %50 = vector.load %arg5[%c0_31, %c3, %c0_32, %c0_33] : memref<1x4x2x32xf32, #tpu.memory_space<vmem>>, vector<1x1x2x32xf32>
      %51 = vector.shape_cast %50 : vector<1x1x2x32xf32> to vector<2x32xf32>
      %52 = vector.shape_cast %31 : vector<2x32xf32> to vector<1x1x2x32xf32>
      tpu.vector_store %arg5[%c0_31, %c3, %c0_32, %c0_33], %52 {strides = array<i32>} : memref<1x4x2x32xf32, #tpu.memory_space<vmem>>, vector<1x1x2x32xf32>,
    } else {
    }
    %c0_i32_16 = arith.constant 0 : i32
    %35 = arith.cmpi ne, %arg2, %c0_i32_16 : i32
    %36 = arith.extui %35 : i1 to i32
    %c0_i32_17 = arith.constant 0 : i32
    %37 = arith.cmpi ne, %36, %c0_i32_17 : i32
    scf.if %37 {
      %c0_21 = arith.constant 0 : index
      %c0_22 = arith.constant 0 : index
      %c0_23 = arith.constant 0 : index
      %c0_24 = arith.constant 0 : index
      %41 = vector.load %arg5[%c0_21, %c0_22, %c0_23, %c0_24] : memref<1x4x2x32xf32, #tpu.memory_space<vmem>>, vector<1x1x2x32xf32>
      %42 = vector.shape_cast %41 : vector<1x1x2x32xf32> to vector<2x32xf32>
      %43 = arith.maximumf %42, %10 : vector<2x32xf32>
      %c0_25 = arith.constant 0 : index
      %c0_26 = arith.constant 0 : index
      %c0_27 = arith.constant 0 : index
      %c0_28 = arith.constant 0 : index
      %44 = vector.load %arg5[%c0_25, %c0_26, %c0_27, %c0_28] : memref<1x4x2x32xf32, #tpu.memory_space<vmem>>, vector<1x1x2x32xf32>
      %45 = vector.shape_cast %44 : vector<1x1x2x32xf32> to vector<2x32xf32>
      %46 = vector.shape_cast %43 : vector<2x32xf32> to vector<1x1x2x32xf32>
      tpu.vector_store %arg5[%c0_25, %c0_26, %c0_27, %c0_28], %46 {strides = array<i32>} : memref<1x4x2x32xf32, #tpu.memory_space<vmem>>, vector<1x1x2x32xf32>,
      %c0_29 = arith.constant 0 : index
      %c1 = arith.constant 1 : index
      %c0_30 = arith.constant 0 : index
      %c0_31 = arith.constant 0 : index
      %47 = vector.load %arg5[%c0_29, %c1, %c0_30, %c0_31] : memref<1x4x2x32xf32, #tpu.memory_space<vmem>>, vector<1x1x2x32xf32>
      %48 = vector.shape_cast %47 : vector<1x1x2x32xf32> to vector<2x32xf32>
      %49 = arith.maximumf %48, %17 : vector<2x32xf32>
      %c0_32 = arith.constant 0 : index
      %c1_33 = arith.constant 1 : index
      %c0_34 = arith.constant 0 : index
      %c0_35 = arith.constant 0 : index
      %50 = vector.load %arg5[%c0_32, %c1_33, %c0_34, %c0_35] : memref<1x4x2x32xf32, #tpu.memory_space<vmem>>, vector<1x1x2x32xf32>
      %51 = vector.shape_cast %50 : vector<1x1x2x32xf32> to vector<2x32xf32>
      %52 = vector.shape_cast %49 : vector<2x32xf32> to vector<1x1x2x32xf32>
      tpu.vector_store %arg5[%c0_32, %c1_33, %c0_34, %c0_35], %52 {strides = array<i32>} : memref<1x4x2x32xf32, #tpu.memory_space<vmem>>, vector<1x1x2x32xf32>,
      %c0_36 = arith.constant 0 : index
      %c2 = arith.constant 2 : index
      %c0_37 = arith.constant 0 : index
      %c0_38 = arith.constant 0 : index
      %53 = vector.load %arg5[%c0_36, %c2, %c0_37, %c0_38] : memref<1x4x2x32xf32, #tpu.memory_space<vmem>>, vector<1x1x2x32xf32>
      %54 = vector.shape_cast %53 : vector<1x1x2x32xf32> to vector<2x32xf32>
      %55 = arith.maximumf %54, %24 : vector<2x32xf32>
      %c0_39 = arith.constant 0 : index
      %c2_40 = arith.constant 2 : index
      %c0_41 = arith.constant 0 : index
      %c0_42 = arith.constant 0 : index
      %56 = vector.load %arg5[%c0_39, %c2_40, %c0_41, %c0_42] : memref<1x4x2x32xf32, #tpu.memory_space<vmem>>, vector<1x1x2x32xf32>
      %57 = vector.shape_cast %56 : vector<1x1x2x32xf32> to vector<2x32xf32>
      %58 = vector.shape_cast %55 : vector<2x32xf32> to vector<1x1x2x32xf32>
      tpu.vector_store %arg5[%c0_39, %c2_40, %c0_41, %c0_42], %58 {strides = array<i32>} : memref<1x4x2x32xf32, #tpu.memory_space<vmem>>, vector<1x1x2x32xf32>,
      %c0_43 = arith.constant 0 : index
      %c3 = arith.constant 3 : index
      %c0_44 = arith.constant 0 : index
      %c0_45 = arith.constant 0 : index
      %59 = vector.load %arg5[%c0_43, %c3, %c0_44, %c0_45] : memref<1x4x2x32xf32, #tpu.memory_space<vmem>>, vector<1x1x2x32xf32>
      %60 = vector.shape_cast %59 : vector<1x1x2x32xf32> to vector<2x32xf32>
      %61 = arith.maximumf %60, %31 : vector<2x32xf32>
      %c0_46 = arith.constant 0 : index
      %c3_47 = arith.constant 3 : index
      %c0_48 = arith.constant 0 : index
      %c0_49 = arith.constant 0 : index
      %62 = vector.load %arg5[%c0_46, %c3_47, %c0_48, %c0_49] : memref<1x4x2x32xf32, #tpu.memory_space<vmem>>, vector<1x1x2x32xf32>
      %63 = vector.shape_cast %62 : vector<1x1x2x32xf32> to vector<2x32xf32>
      %64 = vector.shape_cast %61 : vector<2x32xf32> to vector<1x1x2x32xf32>
      tpu.vector_store %arg5[%c0_46, %c3_47, %c0_48, %c0_49], %64 {strides = array<i32>} : memref<1x4x2x32xf32, #tpu.memory_space<vmem>>, vector<1x1x2x32xf32>,
    } else {
    }
    %c0_i32_18 = arith.constant 0 : i32
    %38 = arith.cmpi eq, %arg2, %c0_i32_18 : i32
    %39 = arith.extui %38 : i1 to i32
    %cst_19 = arith.constant 0xFF800000 : f32
    %c0_i32_20 = arith.constant 0 : i32
    %40 = arith.cmpi ne, %39, %c0_i32_20 : i32
    scf.if %40 {
      %c0_21 = arith.constant 0 : index
      %c0_22 = arith.constant 0 : index
      %c0_23 = arith.constant 0 : index
      %c0_24 = arith.constant 0 : index
      %41 = vector.load %arg5[%c0_21, %c0_22, %c0_23, %c0_24] : memref<1x4x2x32xf32, #tpu.memory_space<vmem>>, vector<1x4x2x32xf32>
      %42 = vector.shape_cast %41 : vector<1x4x2x32xf32> to vector<4x2x32xf32>
      %43 = vector.broadcast %cst_19 : f32 to vector<4x2x32xf32>
      %44 = arith.cmpf oeq, %42, %43 : vector<4x2x32xf32>
      %cst_25 = arith.constant 0.000000e+00 : f32
      %45 = vector.broadcast %cst_25 : f32 to vector<4x2x32xf32>
      %c0_26 = arith.constant 0 : index
      %c0_27 = arith.constant 0 : index
      %c0_28 = arith.constant 0 : index
      %c0_29 = arith.constant 0 : index
      %46 = vector.load %arg5[%c0_26, %c0_27, %c0_28, %c0_29] : memref<1x4x2x32xf32, #tpu.memory_space<vmem>>, vector<1x4x2x32xf32>
      %47 = vector.shape_cast %46 : vector<1x4x2x32xf32> to vector<4x2x32xf32>
      %48 = arith.select %44, %45, %47 : vector<4x2x32xi1>, vector<4x2x32xf32>
      %c0_30 = arith.constant 0 : index
      %c0_31 = arith.constant 0 : index
      %c0_32 = arith.constant 0 : index
      %c0_33 = arith.constant 0 : index
      %49 = vector.load %arg5[%c0_30, %c0_31, %c0_32, %c0_33] : memref<1x4x2x32xf32, #tpu.memory_space<vmem>>, vector<1x4x2x32xf32>
      %50 = vector.shape_cast %49 : vector<1x4x2x32xf32> to vector<4x2x32xf32>
      %51 = vector.shape_cast %48 : vector<4x2x32xf32> to vector<1x4x2x32xf32>
      tpu.vector_store %arg5[%c0_30, %c0_31, %c0_32, %c0_33], %51 {strides = array<i32>} : memref<1x4x2x32xf32, #tpu.memory_space<vmem>>, vector<1x4x2x32xf32>,
    } else {
    }
    return
  }
  func.func @transform_0(%arg0: i32, %arg1: i32, %arg2: i32) -> (i32, i32, i32, i32) {
    %c0_i32 = arith.constant 0 : i32
    %c0_i32_0 = arith.constant 0 : i32
    return %arg0, %arg1, %arg2, %c0_i32 : i32, i32, i32, i32
  }
  func.func @transform_1(%arg0: i32, %arg1: i32, %arg2: i32) -> (i32, i32, i32, i32) {
    %c0_i32 = arith.constant 0 : i32
    %c0_i32_0 = arith.constant 0 : i32
    return %arg0, %arg1, %arg2, %c0_i32 : i32, i32, i32, i32
  }
  func.func @transform_2(%arg0: i32, %arg1: i32, %arg2: i32) -> (i32, i32, i32, i32) {
    %c0_i32 = arith.constant 0 : i32
    %c0_i32_0 = arith.constant 0 : i32
    %c0_i32_1 = arith.constant 0 : i32
    return %arg0, %c0_i32, %arg1, %c0_i32_0 : i32, i32, i32, i32
  }
}

</mosaic_0001>

<bundles_post_ra>
// kernel: tpu_custom_call.1
= control target key start
LH: loop header
LB: loop body
LE: loop exit
PB: predicated region body
PF: predicated region fallthrough
CT: control target
= control target key end

     0   :  { %7 = vsyncpa [#allocation3], 0  ;;  %s1037_s0 = inlined_call_operand.vmem [shape: s32[2,2,16,1], index: 0, kind: input, shape index: {}]   ;;  %s1038_s1 = inlined_call_operand.vmem [shape: f32[2,2,16,32], index: 1, kind: input, shape index: {}]   ;;  %s1039_s2 = inlined_call_operand.hbm [shape: f32[2,4,2,32], index: 2, kind: output, shape index: {}]  }
   0x1   :  { %9 = vsyncpa [#allocation3 + $0x1], 0  ;;  %s842_s9 = smov 0   ;;  %s844_s10 = smov 0  }
   0x2   :  { %s846_s11 = smov 0   ;;  %s848_s12 = smov 0  }
   0x3   :  { %s850_s13 = smov 0   ;;  %s852_s14 = smov 0  }
   0x4 LB: > { %s658_s15 = sadd.s32 4294967295, %s821_s14   ;;  %s659_s16 = sadd.s32 4294967294, %s821_s14   ;;  %s821_s14 = sphi %s852_s14, %s15_s14   ;;  %s817_s13 = sphi %s850_s13, %s1046_s13   ;;  %s813_s12 = sphi %s848_s12, %s1045_s12   ;;  %s809_s11 = sphi %s846_s11, %s1044_s11   ;;  %s805_s10 = sphi %s844_s10, %s1043_s10   ;;  %s801_s9 = sphi %s842_s9, %s1042_s9  }
   0x5   : > { %s34_s17 = sadd.s32 1, %s817_s13  ;;  %s103_s18 = sadd.s32 1, %s809_s11 }
   0x6   : > { %p36_p0 = scmp.ge.s32.totalorder %s34_s17, 2  ;;  %p113_p1 = scmp.ne.s32.totalorder %s809_s11, %s805_s10 }
   0x7   : > { %p114_p2 = scmp.eq.s32.totalorder %s658_s15, 1  ;;  %p119_p3 = scmp.ne.s32.totalorder %s805_s10, %s801_s9 }
   0x8   : > { %s1048_s17 = smov (%p36_p0, %s34_s17), 0  ;;  %p120_p5 = scmp.eq.s32.totalorder %s659_s16, 1 }
   0x9   : > { %p882_p4 = por %p114_p2, %p113_p1  ;;  %s98_s20 = ssub.s32 %s817_s13, %s1048_s17 }
   0xa   : > { %p662_p6 = scmp.ge.s32.totalorder %s821_s14, 1  ;;  %p101_p7 = scmp.eq.s32.totalorder %s98_s20, 0 }
   0xb   : > { %p889_p8 = por %p120_p5, %p119_p3  ;;  %p176_p9 = scmp.lt.s32.totalorder %s821_s14, 3 }
   0xc   : > { %s895_s22 = scalar_select %p101_p7, %s809_s11, %s103_s18  }
   0xd   : > { %p177_p10 = pnand %p662_p6, %p176_p9 }
   0xe   : > { %p223_p11 = scmp.lt.s32.totalorder (!%p177_p10), %s813_s12, 1  ;;  %s218_s3 = sand.u32 (!%p177_p10), 1, %s805_s10  }
   0xf   : > { %180 = sbr.rel (%p177_p10) target bundleno = 221 (0xdd), region = 28  ;;  %s663_s4 = sshll.u32 (!%p177_p10), %s218_s3, 3 }
  0x10   : > { %s946_s5 = scalar_lea.vmem (!%p177_p10), [#allocation2], %s663_s4  ;;  %s684_s6 = sshll.u32 (!%p177_p10), %s813_s12, 7 }
  0x11   : > { %s547_s7 = sshll.u32 (!%p177_p10), %s946_s5, 4  ;;  %s984_s16 = scalar_lea.hbm (!%p177_p10), %s1039_s2, %s684_s6  ;;  %s986_s7 = int_to_ptr.vmem [resolvable:$true] %s547_s7 }
  0x12   : > { %s992_s18 = scalar_lea.sflag (!%p177_p10), [#allocation3], %s218_s3  ;;  %s824_s20 = smov (!%p177_p10), [#allocation2]  }
  0x14   : > { %v823_v0 = vmov 0   ;;  %s899_s23 = scalar_select %p223_p11, %s813_s12, 1 }
  0x15   : > { %744 = vset.pattern.permute.xlu1 %v823_v0  ;;  %743 = vset.pattern.permute.xlu0 %v823_v0  ;;  %s745_s12 = scalar_lea.vmem %s986_s7, 128 }
  0x16   : > { %s682_s24 = sshll.u32 %s899_s23, 5  ;;  %p746_p12 = scmp.ne.s32.totalorder %s986_s7, %s745_s12 }
  0x17   : > { %s234_s27 = scalar_lea.vmem %s1037_s0, %s682_s24  ;;  %s250_s30 = scalar_lea.vmem %s1038_s1, %s682_s24 }
  0x18   : > { %v259_v1 = vld [vmem:[%s234_s27 + $0x10] sm:$0xff]  ;;  %v257_v2 = vld [vmem:[%s234_s27] sm:$0xff]  ;;  %v260_v3 = vld [vmem:[%s234_s27 + $0x18] sm:$0xff]  ;;  %p747_p13 = pnand %p746_p12, %p882_p4  ;;  %s749_s23 = sshll.u32 %s824_s20, 4  ;;  %s750_s23 = int_to_ptr.vmem [resolvable:$false] %s749_s23 }
  0x19   : > { %vm263_vm0 = vcmp.eq.s32.totalorder %v259_v1, 0  ;;  %vm261_vm1 = vcmp.eq.s32.totalorder %v257_v2, 0  ;;  %vm264_vm2 = vcmp.eq.s32.totalorder %v260_v3, 0  ;;  %v258_v4 = vld [vmem:[%s234_s27 + $0x8] sm:$0xff]  ;;  %vm308_vm5 = vcmp.eq.s32.totalorder %v257_v2, 1  ;;  %v912_v23 = vld [vmem:[%s250_s30 + $0x10] sm:$0xff]  ;;  %p752_p1 = scmp.lt.s32.totalorder %s986_s7, %s750_s23 }
  0x1a   : > { %v267_v5 = vsel %vm263_vm0, 1, %v823_v0  ;;  %v265_v6 = vsel %vm261_vm1, 1, %v823_v0  ;;  %vm262_vm3 = vcmp.eq.s32.totalorder %v258_v4, 0  ;;  %v268_v7 = vsel %vm264_vm2, 1, %v823_v0  ;;  %v914_v24 = vld [vmem:[%s250_s30] sm:$0xff]  ;;  %v916_v25 = vld [vmem:[%s250_s30 + $0x18] sm:$0xff]  ;;  %p748_p0 = pneg %p747_p13 }
  0x1b   : > { %276 = vperm.xlu1 %744, %v267_v5   ;;  %270 = vperm.xlu0 %743, %v265_v6   ;;  %v266_v8 = vsel %vm262_vm3, 1, %v823_v0  ;;  %vm309_vm4 = vcmp.eq.s32.totalorder %v258_v4, 1  ;;  %v312_v10 = vsel %vm308_vm5, 1, %v823_v0  ;;  %vm311_vm6 = vcmp.eq.s32.totalorder %v260_v3, 1  ;;  %v918_v26 = vld [vmem:[%s250_s30 + $0x8] sm:$0xff]  ;;  %s751_s24 = scalar_lea.vmem %s750_s23, 256 }
  0x1c   : > { %v313_v9 = vsel %vm309_vm4, 1, %v823_v0  ;;  %vm310_vm7 = vcmp.eq.s32.totalorder %v259_v1, 1  ;;  %v315_v11 = vsel %vm311_vm6, 1, %v823_v0  ;;  %vm355_vm8 = vcmp.eq.s32.totalorder %v258_v4, 2  ;;  %p753_p2 = scmp.lt.s32.totalorder %s751_s24, %s745_s12 }
  0x1d   : > { %v314_v12 = vsel %vm310_vm7, 1, %v823_v0  ;;  %vm354_vm9 = vcmp.eq.s32.totalorder %v257_v2, 2  ;;  %v359_v13 = vsel %vm355_vm8, 1, %v823_v0  ;;  %vm357_vm10 = vcmp.eq.s32.totalorder %v260_v3, 2 }
  0x1e   : > { %v358_v14 = vsel %vm354_vm9, 1, %v823_v0  ;;  %vm356_vm11 = vcmp.eq.s32.totalorder %v259_v1, 2  ;;  %v361_v15 = vsel %vm357_vm10, 1, %v823_v0  ;;  %vm401_vm12 = vcmp.eq.s32.totalorder %v258_v4, 3  ;;  %p754_p3 = por %p753_p2, %p752_p1 }
  0x1f   : > { %279 = vperm.xlu1 %744, %v268_v7   ;;  %273 = vperm.xlu0 %743, %v266_v8   ;;  %v360_v16 = vsel %vm356_vm11, 1, %v823_v0  ;;  %vm400_vm13 = vcmp.eq.s32.totalorder %v257_v2, 3  ;;  %v405_v17 = vsel %vm401_vm12, 1, %v823_v0  ;;  %vm403_vm14 = vcmp.eq.s32.totalorder %v260_v3, 3 }
  0x20   : > { %v404_v18 = vsel %vm400_vm13, 1, %v823_v0  ;;  %vm402_vm15 = vcmp.eq.s32.totalorder %v259_v1, 3  ;;  %v407_v19 = vsel %vm403_vm14, 1, %v823_v0  ;;  %vm289_vm2 = vcmask 261120   ;;  %p755_p5 = pnand %p754_p3, %p748_p0 }
  0x21   : > { %v406_v20 = vsel %vm402_vm15, 1, %v823_v0  ;;  %vm452_vm9 = vcmask 1041409   ;;  %vm455_vm12 = vcmask 254976  }
  0x23   : > { %320 = vperm.xlu1 %744, %v313_v9   ;;  %317 = vperm.xlu0 %743, %v312_v10  }
  0x27   : > { %326 = vperm.xlu1 %744, %v315_v11   ;;  %323 = vperm.xlu0 %743, %v314_v12  }
  0x2b   : > { %366 = vperm.xlu1 %744, %v359_v13   ;;  %363 = vperm.xlu0 %743, %v358_v14  }
  0x2f   : > { %372 = vperm.xlu1 %744, %v361_v15   ;;  %369 = vperm.xlu0 %743, %v360_v16  }
  0x33   : > { %412 = vperm.xlu1 %744, %v405_v17   ;;  %409 = vperm.xlu0 %743, %v404_v18  }
  0x37   : > { %418 = vperm.xlu1 %744, %v407_v19   ;;  %415 = vperm.xlu0 %743, %v406_v20  }
  0x96   : > { %v277_v21 = vpop.permute.xlu1 %276  ;;  %v271_v22 = vpop.permute.xlu0 %270 }
  0x97   : > { %vm283_vm0 = vcmp.eq.s32.totalorder %v277_v21, 1  ;;  %vm281_vm1 = vcmp.eq.s32.totalorder %v271_v22, 1 }
  0x98   : > { %v287_v27 = vsel %vm283_vm0, %v912_v23, -inf  ;;  %v285_v28 = vsel %vm281_vm1, %v914_v24, -inf }
  0x99   : > { %v299_v33 = vsel %vm289_vm2, %v287_v27, -inf  ;;  %v290_v34 = vsel %vm289_vm2, %v285_v28, -inf }
  0x9a   : > { %v280_v29 = vpop.permute.xlu1 %279  ;;  %v274_v30 = vpop.permute.xlu0 %273 }
  0x9b   : > { %vm284_vm3 = vcmp.eq.s32.totalorder %v280_v29, 1  ;;  %vm282_vm4 = vcmp.eq.s32.totalorder %v274_v30, 1 }
  0x9c   : > { %v288_v31 = vsel %vm284_vm3, %v916_v25, -inf  ;;  %v286_v32 = vsel %vm282_vm4, %v918_v26, -inf }
  0x9d   : > { %v300_v35 = vsel %vm289_vm2, %v288_v31, -inf  ;;  %v291_v36 = vsel %vm289_vm2, %v286_v32, -inf }
  0x9e   : > { %v301_v37 = vmax.f32 %v299_v33, %v300_v35  ;;  %v292_v38 = vmax.f32 %v290_v34, %v291_v36  ;;  %v321_v39 = vpop.permute.xlu1 %320  ;;  %v318_v40 = vpop.permute.xlu0 %317 }
  0x9f   : > { %vm329_vm5 = vcmp.eq.s32.totalorder %v321_v39, 1  ;;  %vm328_vm6 = vcmp.eq.s32.totalorder %v318_v40, 1 }
  0xa0   : > { %v302_v41 = vrot.slane %v301_v37, 4  ;;  %v293_v42 = vrot.slane %v292_v38, 4  ;;  %v333_v43 = vsel %vm329_vm5, %v918_v26, -inf  ;;  %v332_v44 = vsel %vm328_vm6, %v914_v24, -inf }
  0xa1   : > { %v337_v45 = vsel %vm289_vm2, %v333_v43, -inf  ;;  %v336_v46 = vsel %vm289_vm2, %v332_v44, -inf }
  0xa2   : > { %v303_v47 = vmax.f32 %v301_v37, %v302_v41  ;;  %v294_v48 = vmax.f32 %v292_v38, %v293_v42  ;;  %v338_v49 = vmax.f32 %v336_v46, %v337_v45  ;;  %v327_v50 = vpop.permute.xlu1 %326  ;;  %v324_v51 = vpop.permute.xlu0 %323 }
  0xa3   : > { %vm331_vm7 = vcmp.eq.s32.totalorder %v327_v50, 1  ;;  %vm330_vm8 = vcmp.eq.s32.totalorder %v324_v51, 1 }
  0xa4   : > { %v304_v52 = vrot.slane %v303_v47, 2  ;;  %v295_v53 = vrot.slane %v294_v48, 2  ;;  %v339_v54 = vrot.slane %v338_v49, 4  ;;  %v335_v55 = vsel %vm331_vm7, %v916_v25, -inf }
  0xa5   : > { %v346_v56 = vsel %vm289_vm2, %v335_v55, -inf  ;;  %v334_v57 = vsel %vm330_vm8, %v912_v23, -inf }
  0xa6   : > { %v305_v58 = vmax.f32 %v303_v47, %v304_v52  ;;  %v296_v59 = vmax.f32 %v294_v48, %v295_v53  ;;  %v340_v60 = vmax.f32 %v338_v49, %v339_v54  ;;  %v345_v61 = vsel %vm289_vm2, %v334_v57, -inf  ;;  %v367_v62 = vpop.permute.xlu1 %366  ;;  %v364_v63 = vpop.permute.xlu0 %363 }
  0xa7   : > { %v347_v0 = vmax.f32 %v345_v61, %v346_v56  ;;  %vm375_vm10 = vcmp.eq.s32.totalorder %v367_v62, 1  ;;  %vm374_vm11 = vcmp.eq.s32.totalorder %v364_v63, 1 }
  0xa8   : > { %v306_v1 = vrot.slane %v305_v58, 1  ;;  %v297_v2 = vrot.slane %v296_v59, 1  ;;  %v341_v3 = vrot.slane %v340_v60, 2  ;;  %v379_v4 = vsel %vm375_vm10, %v918_v26, -inf }
  0xa9   : > { %v348_v5 = vrot.slane %v347_v0, 4  ;;  %v383_v6 = vsel %vm289_vm2, %v379_v4, -inf  ;;  %v378_v7 = vsel %vm374_vm11, %v914_v24, -inf }
  0xaa   : > { %v307_v8 = vmax.f32 %v305_v58, %v306_v1  ;;  %v298_v9 = vmax.f32 %v296_v59, %v297_v2  ;;  %v342_v10 = vmax.f32 %v340_v60, %v341_v3  ;;  %v382_v11 = vsel %vm289_vm2, %v378_v7, -inf  ;;  %v373_v12 = vpop.permute.xlu1 %372  ;;  %v370_v13 = vpop.permute.xlu0 %369 }
  0xab   : > { %v349_v14 = vmax.f32 %v347_v0, %v348_v5  ;;  %v384_v15 = vmax.f32 %v382_v11, %v383_v6  ;;  %vm377_vm13 = vcmp.eq.s32.totalorder %v373_v12, 1  ;;  %vm376_vm14 = vcmp.eq.s32.totalorder %v370_v13, 1 }
  0xac   : > { %v453_v16 = vsel %vm452_vm9, %v307_v8, %v298_v9  ;;  %v381_v17 = vsel %vm377_vm13, %v916_v25, -inf  ;;  %v380_v18 = vsel %vm376_vm14, %v912_v23, -inf  ;;  %v343_v27 = vrot.slane %v342_v10, 1 }
  0xad   : > { %456 = vst.msk [vmem:[%s946_s5] sm:$0x3] %vm455_vm12, %v453_v16  ;;  %v350_v19 = vrot.slane %v349_v14, 2  ;;  %v385_v20 = vrot.slane %v384_v15, 4  ;;  %v392_v21 = vsel %vm289_vm2, %v381_v17, -inf  ;;  %v391_v22 = vsel %vm289_vm2, %v380_v18, -inf }
  0xae   : > { %v393_v28 = vmax.f32 %v391_v22, %v392_v21  ;;  %v413_v29 = vpop.permute.xlu1 %412  ;;  %v410_v30 = vpop.permute.xlu0 %409  ;;  %v344_v40 = vmax.f32 %v342_v10, %v343_v27 }
  0xaf   : > { %v351_v31 = vmax.f32 %v349_v14, %v350_v19  ;;  %v386_v32 = vmax.f32 %v384_v15, %v385_v20  ;;  %vm421_vm15 = vcmp.eq.s32.totalorder %v413_v29, 1  ;;  %vm420_vm0 = vcmp.eq.s32.totalorder %v410_v30, 1 }
  0xb0   : > { %v394_v33 = vrot.slane %v393_v28, 4  ;;  %v425_v34 = vsel %vm421_vm15, %v918_v26, -inf  ;;  %v424_v35 = vsel %vm420_vm0, %v914_v24, -inf }
  0xb1   : > { %v352_v36 = vrot.slane %v351_v31, 1  ;;  %v387_v37 = vrot.slane %v386_v32, 2  ;;  %v429_v38 = vsel %vm289_vm2, %v425_v34, -inf  ;;  %v428_v39 = vsel %vm289_vm2, %v424_v35, -inf }
  0xb2   : > { %v395_v41 = vmax.f32 %v393_v28, %v394_v33  ;;  %v430_v42 = vmax.f32 %v428_v39, %v429_v38  ;;  %v419_v43 = vpop.permute.xlu1 %418  ;;  %v416_v44 = vpop.permute.xlu0 %415 }
  0xb3   : > { %v353_v45 = vmax.f32 %v351_v31, %v352_v36  ;;  %v388_v46 = vmax.f32 %v386_v32, %v387_v37  ;;  %vm423_vm1 = vcmp.eq.s32.totalorder %v419_v43, 1  ;;  %vm422_vm3 = vcmp.eq.s32.totalorder %v416_v44, 1 }
  0xb4   : > { %v396_v26 = vrot.slane %v395_v41, 2  ;;  %v431_v47 = vrot.slane %v430_v42, 4  ;;  %v427_v24 = vsel %vm423_vm1, %v916_v25, -inf  ;;  %v426_v48 = vsel %vm422_vm3, %v912_v23, -inf  ;;  %v515_v49 = vld [vmem:[%s946_s5] sm:$0x3] }
  0xb5   : > { %v459_v50 = vsel %vm452_vm9, %v353_v45, %v344_v40  ;;  %v389_v51 = vrot.slane %v388_v46, 1  ;;  %v438_v52 = vsel %vm289_vm2, %v427_v24, -inf  ;;  %v437_v53 = vsel %vm289_vm2, %v426_v48, -inf }
  0xb6   : > { %668 = vst.msk [vmem:[%s946_s5 + $0x2] sm:$0x3] %vm455_vm12, %v459_v50  ;;  %v397_v54 = vmax.f32 %v395_v41, %v396_v26  ;;  %v432_v55 = vmax.f32 %v430_v42, %v431_v47  ;;  %v439_v56 = vmax.f32 %v437_v53, %v438_v52  ;;  %vm519_vm4 = vcmp.eq.f32.partialorder %v515_v49, -inf }
  0xb7   : > { %v523_v25 = vsel %vm519_vm4, 0.0, %v515_v49  ;;  %v390_v59 = vmax.f32 %v388_v46, %v389_v51 }
  0xb8   : > { %v398_v57 = vrot.slane %v397_v54, 1  ;;  %v433_v58 = vrot.slane %v432_v55, 2  ;;  %v440_v23 = vrot.slane %v439_v56, 4  ;;  %528 = vst.msk [vmem:[%s946_s5] sm:$0x3] %vm455_vm12, %v523_v25 }
  0xba   : > { %v399_v60 = vmax.f32 %v397_v54, %v398_v57  ;;  %v434_v61 = vmax.f32 %v432_v55, %v433_v58  ;;  %v441_v62 = vmax.f32 %v439_v56, %v440_v23 }
  0xbc   : > { %v465_v63 = vsel %vm452_vm9, %v399_v60, %v390_v59  ;;  %v442_v0 = vrot.slane %v441_v62, 2  ;;  %v435_v2 = vrot.slane %v434_v61, 1 }
  0xbd   : > { %669 = vst.msk [vmem:[%s946_s5 + $0x4] sm:$0x3] %vm455_vm12, %v465_v63  ;;  %v516_v1 = vld [vmem:[%s946_s5 + $0x2] sm:$0x3] }
  0xbe   : > { %v443_v3 = vmax.f32 %v441_v62, %v442_v0  ;;  %vm520_vm2 = vcmp.eq.f32.partialorder %v516_v1, -inf  ;;  %v436_v6 = vmax.f32 %v434_v61, %v435_v2 }
  0xbf   : > { %v524_v4 = vsel %vm520_vm2, 0.0, %v516_v1 }
  0xc0   : > { %v444_v5 = vrot.slane %v443_v3, 1  ;;  %529 = vst.msk [vmem:[%s946_s5 + $0x2] sm:$0x3] %vm455_vm12, %v524_v4 }
  0xc2   : > { %v445_v7 = vmax.f32 %v443_v3, %v444_v5 }
  0xc4   : > { %v471_v8 = vsel %vm452_vm9, %v445_v7, %v436_v6  ;;  %v517_v9 = vld [vmem:[%s946_s5 + $0x4] sm:$0x3] }
  0xc5   : > { %670 = vst.msk [vmem:[%s946_s5 + $0x6] sm:$0x3] %vm455_vm12, %v471_v8  ;;  %vm521_vm5 = vcmp.eq.f32.partialorder %v517_v9, -inf }
  0xc6   : > { %v525_v10 = vsel %vm521_vm5, 0.0, %v517_v9 }
  0xc7   : > { %530 = vst.msk [vmem:[%s946_s5 + $0x4] sm:$0x3] %vm455_vm12, %v525_v10 }
  0xcc   : > { %v518_v11 = vld [vmem:[%s946_s5 + $0x6] sm:$0x3] }
  0xcd   : > { %vm522_vm6 = vcmp.eq.f32.partialorder %v518_v11, -inf }
  0xce   : > { %v526_v12 = vsel %vm522_vm6, 0.0, %v518_v11 }
  0xcf   : > { %531 = vst.msk [vmem:[%s946_s5 + $0x6] sm:$0x3] %vm455_vm12, %v526_v12 }
  0xd0   : > { %758 = shalt.err (!%p755_p5)
}
  0xd1   : > { %s759_s25 = scalar_lea.hbm %s984_s16, 128  ;;  %s763_s28 = scalar_lea.hbm %s1039_s2, 256 }
  0xd2   : > { %p760_p6 = scmp.ne.s32.totalorder %s984_s16, %s759_s25  ;;  %p764_p10 = scmp.lt.s32.totalorder %s984_s16, %s1039_s2 }
  0xd3   : > { %p765_p11 = scmp.lt.s32.totalorder %s763_s28, %s759_s25 }
  0xd4   : > { %p761_p7 = pnand %p760_p6, %p882_p4 }
  0xd5   : > { %p766_p12 = por %p765_p11, %p764_p10 }
  0xd6   : > { %p762_p9 = pneg %p761_p7 }
  0xd8   : > { %p767_p13 = pnand %p766_p12, %p762_p9 }
  0xda   : > { %770 = shalt.err (!%p767_p13)
}
  0xdb   : > { %s825_s3 = smov 32   ;;  %s826_s4 = smov 2  }
  0xdc   : > { %685 = dma.vmem_to_hbm [thread:$0]  (%p882_p4), %s986_s7, 128, %s984_s16, %s992_s18, %s825_s3, %s825_s3, %s826_s4  }
  0xdd PF: > { %p691_p0 = scmp.ge.s32.totalorder %s821_s14, 2  ;;  %s562_s5 = sand.u32 1, %s801_s9  }
  0xde   : > { %s563_s6 = scalar_lea.sflag [#allocation3], %s562_s5 }
  0xdf   : > { %p688_p1 = pnand %p691_p0, %p889_p8 }
  0xe1   : > { %p689_p2 = pneg %p688_p1 }
  0xe3   : > { %796 = dma.done.wait (%p689_p2), %s563_s6, 128  }
  0xe4   : > { %798 = vsyncadd (%p689_p2), %s563_s6, 4294967168  ;;  %s15_s14 = sadd.s32 1, %s821_s14   ;;  %s1042_s9 = smov %s805_s10 }
  0xe5   : > { %p12_p3 = scmp.ge.s32.totalorder %s15_s14, 4   ;;  %s1043_s10 = smov %s809_s11 }
  0xe6   : > { %s1044_s11 = smov %s895_s22  ;;  %s1045_s12 = smov %s817_s13 }
  0xe7   : > { %s1046_s13 = smov %s1048_s17  ;;  %14 = sbr.rel (!%p12_p3) target bundleno = 4 (0x4), region = 84 }
  0xec   :  { %568 = vsyncpa [#allocation3], 1 }
  0xed   :  { %570 = vsyncpa [#allocation3 + $0x1], 1 }

</bundles_post_ra>
